<compile_context>
chip_gen: v7x
topology: tpu7x:2x2x1
jax: 0.10.0
libtpu: 0.0.40
codegen_flags: <defaults>
</compile_context>

<pallas_src>
import functools
import math

import jax
import jax.numpy as jnp
from jax.experimental import pallas as pl
from jax.experimental.pallas import tpu as pltpu


def _mha_kernel(x_ref, wqkv_ref, add_ref, wo_ref, bo_ref, out_ref, *, num_heads):
    """MultiheadAttention(query=x, key=x+pos, value=x+pos) for one batch row.

    Everything is computed in the transposed (features, seq) orientation:
      x_ref/out_ref blocks : (1, E, S)   (E == C == embed_dim)
      wqkv_ref             : (3E, E)     = PyTorch in_proj_weight
      add_ref              : (3E, S)     = [bq ; Wk@pos^T+bk ; Wv@pos^T+bv]
      wo_ref               : (E, E)      = PyTorch out_proj.weight
      bo_ref               : (E, 1)      = out_proj.bias
    """
    xT = x_ref[0]                          # (E, S) = x_seq^T
    E, S = xT.shape
    hd = E // num_heads
    scale = 1.0 / math.sqrt(hd)
    bf16 = jnp.bfloat16

    # ---- fused QKV projection: one MXU matmul, (3E, S) ----
    qkv = jnp.dot(wqkv_ref[...].astype(bf16), xT.astype(bf16),
                  preferred_element_type=jnp.float32)
    qkv = qkv + add_ref[...]               # biases + pos-folded K/V offsets (f32)

    # Static sublane slices (multiples of 8) + free leading-axis splits.
    q = qkv[:E].reshape(num_heads, hd, S)          # (H, hd, S)
    k = qkv[E:2 * E].reshape(num_heads, hd, S)     # (H, hd, S)
    v = qkv[2 * E:].reshape(num_heads, hd, S)      # (H, hd, S)

    # ---- batched-head scaled-dot-product attention (f32 softmax math) ----
    q_t = jnp.swapaxes(q, 1, 2)                    # (H, Sq, hd)
    s = jnp.einsum('hqd,hdk->hqk',
                   q_t.astype(bf16), k.astype(bf16),
                   preferred_element_type=jnp.float32) * scale   # (H, Sq, Sk)
    s = s - jnp.max(s, axis=-1, keepdims=True)
    p = jnp.exp(s)
    p = p * pl.reciprocal(jnp.sum(p, axis=-1, keepdims=True), approx=True)

    o = jnp.einsum('hdk,hqk->hdq',
                   v.astype(bf16), p.astype(bf16),
                   preferred_element_type=jnp.float32)           # (H, hd, Sq)
    o = o.reshape(E, S)                    # head "concat" = free axis merge

    # ---- out-projection (transposed): out^T = Wo @ o^T + bo ----
    out = jnp.dot(wo_ref[...].astype(bf16), o.astype(bf16),
                  preferred_element_type=jnp.float32) + bo_ref[...]
    out_ref[0] = out.astype(out_ref.dtype)


def cross_attention_embedder(x_nchw, params, num_heads):
    """Pallas implementation of CrossAttentionEmbedder.forward (NCHW in / out)."""
    B, C = x_nchw.shape[:2]
    spatial = x_nchw.shape[2:]
    S = math.prod(spatial)
    E = C                                   # embed_dim == channels

    # x.view(B, C, -1): free view; the kernel works on the transposed layout.
    x_cs = x_nchw.reshape(B, C, S)

    w_in = params["in_proj_weight"]         # (3E, E)
    b_in = params["in_proj_bias"]           # (3E,)
    pos = params["pos"]                     # (S, E)
    wo = params["out_proj_weight"]          # (E, E)
    bo = params["out_proj_bias"][:, None]   # (E, 1)

    # Fold the positional embedding + in-proj biases into one (3E, S) additive
    # term:  rows [0:E)=bq,  [E:2E)=Wk@pos^T+bk,  [2E:3E)=Wv@pos^T+bv.
    pos_kv = w_in[E:] @ pos.T                                       # (2E, S)
    add = jnp.concatenate(
        [jnp.zeros((E, S), w_in.dtype), pos_kv], axis=0) + b_in[:, None]

    hd = E // num_heads
    flops = B * (2 * (3 * E) * E * S        # fused QKV projection
                 + 2 * S * S * E            # scores (all heads)
                 + 2 * S * S * E            # p @ v   (all heads)
                 + 2 * E * E * S)           # out projection
    transcendentals = B * num_heads * S * S
    bytes_accessed = 4 * (2 * B * C * S + 3 * E * E + 3 * E * S + E * E + E)

    kernel = functools.partial(_mha_kernel, num_heads=num_heads)

    out_cs = pl.pallas_call(
        kernel,
        out_shape=jax.ShapeDtypeStruct((B, C, S), x_nchw.dtype),
        grid_spec=pltpu.PrefetchScalarGridSpec(
            num_scalar_prefetch=0,
            grid=(B,),
            in_specs=[
                pl.BlockSpec((1, C, S), lambda b: (b, 0, 0)),    # x (transposed seq)
                pl.BlockSpec((3 * E, E), lambda b: (0, 0)),      # in_proj_weight
                pl.BlockSpec((3 * E, S), lambda b: (0, 0)),      # additive term
                pl.BlockSpec((E, E), lambda b: (0, 0)),          # out_proj.weight
                pl.BlockSpec((E, 1), lambda b: (0, 0)),          # out_proj.bias
            ],
            out_specs=pl.BlockSpec((1, C, S), lambda b: (b, 0, 0)),
        ),
        compiler_params=pltpu.CompilerParams(
            dimension_semantics=("parallel",)),
        cost_estimate=pl.CostEstimate(
            flops=flops, transcendentals=transcendentals,
            bytes_accessed=bytes_accessed),
    )(x_cs, w_in, add, wo, bo)

    # .permute(0,2,1).view(B,C,*spatial): the kernel already wrote the
    # channel-major layout, so this is a free reshape.
    return out_cs.reshape(B, C, *spatial)


def reference(x_nchw, params, num_heads):
    """Pure-JAX f32 reference mirroring nn.MultiheadAttention(batch_first=True)."""
    B, C = x_nchw.shape[:2]
    spatial = x_nchw.shape[2:]
    S, E = math.prod(spatial), C
    x = jnp.transpose(x_nchw.reshape(B, C, S), (0, 2, 1))           # (B, S, E)
    pe = x + params["pos"][None]
    w_in, b_in = params["in_proj_weight"], params["in_proj_bias"]
    wq, wk, wv = w_in[:E], w_in[E:2 * E], w_in[2 * E:]
    bq, bk, bv = b_in[:E], b_in[E:2 * E], b_in[2 * E:]
    q = x @ wq.T + bq
    k = pe @ wk.T + bk
    v = pe @ wv.T + bv
    hd = E // num_heads
    qh = q.reshape(B, S, num_heads, hd).transpose(0, 2, 1, 3)
    kh = k.reshape(B, S, num_heads, hd).transpose(0, 2, 1, 3)
    vh = v.reshape(B, S, num_heads, hd).transpose(0, 2, 1, 3)
    s = jnp.einsum('bhqd,bhkd->bhqk', qh, kh) / math.sqrt(hd)
    p = jax.nn.softmax(s, axis=-1)
    o = jnp.einsum('bhqk,bhkd->bhqd', p, vh).transpose(0, 2, 1, 3).reshape(B, S, E)
    out = o @ params["out_proj_weight"].T + params["out_proj_bias"]
    return jnp.transpose(out, (0, 2, 1)).reshape(B, C, *spatial)


def init_params(key, seq_len, embed_dim):
    """Deterministic synthetic init matching nn.MultiheadAttention param shapes."""
    k1, k2, k3, k4, k5 = jax.random.split(key, 5)
    return {
        "in_proj_weight": jax.random.normal(
            k1, (3 * embed_dim, embed_dim), jnp.float32) * 0.1,
        "in_proj_bias": jax.random.normal(k2, (3 * embed_dim,), jnp.float32) * 0.1,
        "out_proj_weight": jax.random.normal(
            k3, (embed_dim, embed_dim), jnp.float32) * 0.1,
        "out_proj_bias": jax.random.normal(k4, (embed_dim,), jnp.float32) * 0.1,
        "pos": jax.random.normal(k5, (seq_len, embed_dim), jnp.float32) * 0.1,
    }


if __name__ == "__main__":
    B, C, H, W = 2, 32, 8, 8          # embed_dim = C = 32, S = 64
    num_heads = 4                      # head_dim = 8
    key = jax.random.PRNGKey(0)
    k_x, k_p = jax.random.split(key)
    x = jax.random.normal(k_x, (B, C, H, W), jnp.float32)
    params = init_params(k_p, H * W, C)

    out = cross_attention_embedder(x, params, num_heads)
    out = jax.block_until_ready(out)

    ref = reference(x, params, num_heads)
    assert out.shape == (B, C, H, W)
    # bf16 MXU operands + approximate reciprocal vs f32 reference -> loosened tol.
    assert jnp.allclose(out, ref, atol=2e-2, rtol=2e-2)
    print("KERNEL_OK")
</pallas_src>

<mosaic_0001>
module attributes {stable_mosaic.version = 11 : i64} {
  func.func @_mha_kernel(%arg0: i32, %arg1: memref<1x32x64xf32, #tpu.memory_space<vmem>>, %arg2: memref<96x32xf32, #tpu.memory_space<vmem>>, %arg3: memref<96x64xf32, #tpu.memory_space<vmem>>, %arg4: memref<32x32xf32, #tpu.memory_space<vmem>>, %arg5: memref<32x1xf32, #tpu.memory_space<vmem>>, %arg6: memref<1x32x64xf32, #tpu.memory_space<vmem>>) attributes {dimension_semantics = [#tpu.dimension_semantics<parallel>], iteration_bounds = array<i64: 2>, scalar_prefetch = 0 : i64, scratch_operands = 0 : i64, tpu.core_type = #tpu.core_type<tc>, window_params = [{transform_indices = @transform_0, window_bounds = array<i64: 1, 32, 64>}, {pipeline_mode = #tpu.pipeline_mode<synchronous>, transform_indices = @transform_1, window_bounds = array<i64: 96, 32>}, {pipeline_mode = #tpu.pipeline_mode<synchronous>, transform_indices = @transform_2, window_bounds = array<i64: 96, 64>}, {pipeline_mode = #tpu.pipeline_mode<synchronous>, transform_indices = @transform_3, window_bounds = array<i64: 32, 32>}, {pipeline_mode = #tpu.pipeline_mode<synchronous>, transform_indices = @transform_4, window_bounds = array<i64: 32, 1>}, {transform_indices = @transform_5, window_bounds = array<i64: 1, 32, 64>}]} {
    %c0 = arith.constant 0 : index
    %c0_0 = arith.constant 0 : index
    %c0_1 = arith.constant 0 : index
    %0 = vector.load %arg1[%c0, %c0_0, %c0_1] : memref<1x32x64xf32, #tpu.memory_space<vmem>>, vector<1x32x64xf32>
    %1 = vector.shape_cast %0 : vector<1x32x64xf32> to vector<32x64xf32>
    %c0_2 = arith.constant 0 : index
    %c0_3 = arith.constant 0 : index
    %2 = vector.load %arg2[%c0_2, %c0_3] : memref<96x32xf32, #tpu.memory_space<vmem>>, vector<96x32xf32>
    %3 = arith.truncf %2 : vector<96x32xf32> to vector<96x32xbf16>
    %4 = arith.truncf %1 : vector<32x64xf32> to vector<32x64xbf16>
    %cst = arith.constant dense<0.000000e+00> : vector<96x64xf32>
    %5 = tpu.matmul %3, %4, %cst {dimension_numbers = #tpu.dot_dimension_numbers<[1], [0], [0], [1], [0, 0, 1, 1], [], []>} : vector<96x32xbf16>, vector<32x64xbf16>, vector<96x64xf32> -> vector<96x64xf32>
    %c0_4 = arith.constant 0 : index
    %c0_5 = arith.constant 0 : index
    %6 = vector.load %arg3[%c0_4, %c0_5] : memref<96x64xf32, #tpu.memory_space<vmem>>, vector<96x64xf32>
    %7 = arith.addf %5, %6 : vector<96x64xf32>
    %8 = vector.extract_strided_slice %7 {offsets = [0, 0], sizes = [32, 64], strides = [1, 1]} : vector<96x64xf32> to vector<32x64xf32>
    %9 = vector.shape_cast %8 : vector<32x64xf32> to vector<4x8x64xf32>
    %10 = vector.extract_strided_slice %7 {offsets = [32, 0], sizes = [32, 64], strides = [1, 1]} : vector<96x64xf32> to vector<32x64xf32>
    %11 = vector.shape_cast %10 : vector<32x64xf32> to vector<4x8x64xf32>
    %12 = vector.extract_strided_slice %7 {offsets = [64, 0], sizes = [32, 64], strides = [1, 1]} : vector<96x64xf32> to vector<32x64xf32>
    %13 = vector.shape_cast %12 : vector<32x64xf32> to vector<4x8x64xf32>
    %14 = tpu.transpose %9, [0, 2, 1] : vector<4x8x64xf32> -> vector<4x64x8xf32>
    %15 = arith.truncf %14 : vector<4x64x8xf32> to vector<4x64x8xbf16>
    %16 = arith.truncf %11 : vector<4x8x64xf32> to vector<4x8x64xbf16>
    "tpu.trace_start"() <{level = 10 : i32, message = "hqd,hdk->hqk"}> : () -> ()
    %cst_6 = arith.constant dense<0.000000e+00> : vector<4x64x64xf32>
    %17 = tpu.matmul %15, %16, %cst_6 {dimension_numbers = #tpu.dot_dimension_numbers<[2], [1], [1], [2], [0, 0, 0, 1, 1, 2], [0], [0]>} : vector<4x64x8xbf16>, vector<4x8x64xbf16>, vector<4x64x64xf32> -> vector<4x64x64xf32>
    "tpu.trace_stop"() : () -> ()
    %cst_7 = arith.constant 0.353553385 : f32
    %18 = vector.broadcast %cst_7 : f32 to vector<4x64x64xf32>
    %19 = arith.mulf %17, %18 : vector<4x64x64xf32>
    %cst_8 = arith.constant dense<0xFF800000> : vector<4x64xf32>
    %20 = vector.multi_reduction <maximumf>, %19, %cst_8 [2] : vector<4x64x64xf32> to vector<4x64xf32>
    %21 = vector.shape_cast %20 : vector<4x64xf32> to vector<4x64x1xf32>
    %22 = vector.broadcast %21 : vector<4x64x1xf32> to vector<4x64x64xf32>
    %23 = arith.subf %19, %22 : vector<4x64x64xf32>
    %24 = math.exp %23 : vector<4x64x64xf32>
    %cst_9 = arith.constant dense<0.000000e+00> : vector<4x64xf32>
    %25 = vector.multi_reduction <add>, %24, %cst_9 [2] : vector<4x64x64xf32> to vector<4x64xf32>
    %26 = vector.shape_cast %25 : vector<4x64xf32> to vector<4x64x1xf32>
    %27 = tpu.reciprocal %26 {approx = true} : vector<4x64x1xf32> -> vector<4x64x1xf32>
    %28 = vector.broadcast %27 : vector<4x64x1xf32> to vector<4x64x64xf32>
    %29 = arith.mulf %24, %28 : vector<4x64x64xf32>
    %30 = arith.truncf %13 : vector<4x8x64xf32> to vector<4x8x64xbf16>
    %31 = arith.truncf %29 : vector<4x64x64xf32> to vector<4x64x64xbf16>
    "tpu.trace_start"() <{level = 10 : i32, message = "hdk,hqk->hdq"}> : () -> ()
    %cst_10 = arith.constant dense<0.000000e+00> : vector<4x8x64xf32>
    %32 = tpu.matmul %30, %31, %cst_10 {dimension_numbers = #tpu.dot_dimension_numbers<[2], [2], [1], [1], [0, 0, 0, 1, 1, 1], [0], [0]>} : vector<4x8x64xbf16>, vector<4x64x64xbf16>, vector<4x8x64xf32> -> vector<4x8x64xf32>
    "tpu.trace_stop"() : () -> ()
    %33 = vector.shape_cast %32 : vector<4x8x64xf32> to vector<32x64xf32>
    %c0_11 = arith.constant 0 : index
    %c0_12 = arith.constant 0 : index
    %34 = vector.load %arg4[%c0_11, %c0_12] : memref<32x32xf32, #tpu.memory_space<vmem>>, vector<32x32xf32>
    %35 = arith.truncf %34 : vector<32x32xf32> to vector<32x32xbf16>
    %36 = arith.truncf %33 : vector<32x64xf32> to vector<32x64xbf16>
    %cst_13 = arith.constant dense<0.000000e+00> : vector<32x64xf32>
    %37 = tpu.matmul %35, %36, %cst_13 {dimension_numbers = #tpu.dot_dimension_numbers<[1], [0], [0], [1], [0, 0, 1, 1], [], []>} : vector<32x32xbf16>, vector<32x64xbf16>, vector<32x64xf32> -> vector<32x64xf32>
    %c0_14 = arith.constant 0 : index
    %c0_15 = arith.constant 0 : index
    %38 = vector.load %arg5[%c0_14, %c0_15] : memref<32x1xf32, #tpu.memory_space<vmem>>, vector<32x1xf32>
    %39 = vector.broadcast %38 : vector<32x1xf32> to vector<32x64xf32>
    %40 = arith.addf %37, %39 : vector<32x64xf32>
    %c0_16 = arith.constant 0 : index
    %c0_17 = arith.constant 0 : index
    %c0_18 = arith.constant 0 : index
    %41 = vector.load %arg6[%c0_16, %c0_17, %c0_18] : memref<1x32x64xf32, #tpu.memory_space<vmem>>, vector<1x32x64xf32>
    %42 = vector.shape_cast %41 : vector<1x32x64xf32> to vector<32x64xf32>
    %43 = vector.shape_cast %40 : vector<32x64xf32> to vector<1x32x64xf32>
    tpu.vector_store %arg6[%c0_16, %c0_17, %c0_18], %43 {strides = array<i32>} : memref<1x32x64xf32, #tpu.memory_space<vmem>>, vector<1x32x64xf32>,
    return
  }
  func.func @transform_0(%arg0: i32) -> (i32, i32, i32) {
    %c0_i32 = arith.constant 0 : i32
    %c0_i32_0 = arith.constant 0 : i32
    %c0_i32_1 = arith.constant 0 : i32
    return %arg0, %c0_i32, %c0_i32_0 : i32, i32, i32
  }
  func.func @transform_1(%arg0: i32) -> (i32, i32) {
    %c0_i32 = arith.constant 0 : i32
    %c0_i32_0 = arith.constant 0 : i32
    %c0_i32_1 = arith.constant 0 : i32
    return %c0_i32, %c0_i32_0 : i32, i32
  }
  func.func @transform_2(%arg0: i32) -> (i32, i32) {
    %c0_i32 = arith.constant 0 : i32
    %c0_i32_0 = arith.constant 0 : i32
    %c0_i32_1 = arith.constant 0 : i32
    return %c0_i32, %c0_i32_0 : i32, i32
  }
  func.func @transform_3(%arg0: i32) -> (i32, i32) {
    %c0_i32 = arith.constant 0 : i32
    %c0_i32_0 = arith.constant 0 : i32
    %c0_i32_1 = arith.constant 0 : i32
    return %c0_i32, %c0_i32_0 : i32, i32
  }
  func.func @transform_4(%arg0: i32) -> (i32, i32) {
    %c0_i32 = arith.constant 0 : i32
    %c0_i32_0 = arith.constant 0 : i32
    %c0_i32_1 = arith.constant 0 : i32
    return %c0_i32, %c0_i32_0 : i32, i32
  }
  func.func @transform_5(%arg0: i32) -> (i32, i32, i32) {
    %c0_i32 = arith.constant 0 : i32
    %c0_i32_0 = arith.constant 0 : i32
    %c0_i32_1 = arith.constant 0 : i32
    return %arg0, %c0_i32, %c0_i32_0 : i32, i32, i32
  }
}

</mosaic_0001>

<bundles_post_ra>
// kernel: tpu_custom_call.1
= control target key start
LH: loop header
LB: loop body
LE: loop exit
PB: predicated region body
PF: predicated region fallthrough
CT: control target
= control target key end

     0   :  { %10 = vsyncpa [#allocation3], 0  ;;  %s2784_s0 = inlined_call_operand.vmem [shape: f32[2,32,64], index: 0, kind: input, shape index: {}]   ;;  %s2785_s1 = inlined_call_operand.vmem [shape: f32[96,32], index: 1, kind: input, shape index: {}]   ;;  %s2786_s2 = inlined_call_operand.vmem [shape: f32[96,64], index: 2, kind: input, shape index: {}]   ;;  %s2787_s3 = inlined_call_operand.vmem [shape: f32[32,32], index: 3, kind: input, shape index: {}]   ;;  %s2788_s4 = inlined_call_operand.vmem [shape: f32[32,1], index: 4, kind: input, shape index: {}]   ;;  %s2789_s5 = inlined_call_operand.hbm [shape: f32[2,32,64], index: 5, kind: output, shape index: {}]  }
   0x1   :  { %12 = vsyncpa [#allocation3 + $0x1], 0  ;;  %s2148_s18 = smov 0   ;;  %s2150_s19 = smov 0  }
   0x2   :  { %s2152_s20 = smov 0   ;;  %s2154_s21 = smov 0  }
   0x3 LB: > { %s2169_s22 = sadd.s32 4294967295, %s2110_s21   ;;  %s1622_s23 = sadd.s32 4294967294, %s2110_s21   ;;  %s2110_s21 = sphi %s2154_s21, %s2795_s21   ;;  %s2106_s20 = sphi %s2152_s20, %s2794_s20   ;;  %s2102_s19 = sphi %s2150_s19, %s2793_s19   ;;  %s2098_s18 = sphi %s2148_s18, %s2792_s18  }
   0x4   : > { %s2173_s24 = sadd.s32 1, %s2110_s21   ;;  %s135_s25 = sadd.s32 1, %s2106_s20 }
   0x5   : > { %s132_s26 = ssub.s32 %s2110_s21, %s2173_s24  ;;  %p145_p0 = scmp.ne.s32.totalorder %s2106_s20, %s2102_s19 }
   0x6   : > { %p133_p1 = scmp.eq.s32.totalorder %s132_s26, 0  ;;  %p146_p2 = scmp.eq.s32.totalorder %s2169_s22, 1 }
   0x7   : > { %p151_p3 = scmp.ne.s32.totalorder %s2102_s19, %s2098_s18  ;;  %p152_p4 = scmp.eq.s32.totalorder %s1622_s23, 1 }
   0x8   : > { %s2184_s27 = scalar_select %p133_p1, %s2106_s20, %s135_s25  }
   0x9   : > { %p2186_p5 = por %p146_p2, %p145_p0  ;;  %p2190_p6 = por %p152_p4, %p151_p3 }
   0xa   : > { %p1625_p7 = scmp.ge.s32.totalorder %s2110_s21, 1  ;;  %p190_p8 = scmp.lt.s32.totalorder %s2110_s21, 3 }
   0xc   : > { %p191_p9 = pnand %p1625_p7, %p190_p8 }
   0xd   : > { %p218_p10 = scmp.lt.s32.totalorder (!%p191_p9), %s2169_s22, 1  ;;  %v228_v0 = vld [vmem:[%s2785_s1] sm:$0xff] (!%p191_p9)  ;;  %v229_v1 = vld [vmem:[%s2785_s1 + $0x8] sm:$0xff] (!%p191_p9)  ;;  %vm260_vm0 = vcmask (!%p191_p9), 261120   ;;  %v230_v9 = vld [vmem:[%s2785_s1 + $0x10] sm:$0xff] (!%p191_p9)  ;;  %vm521_vm1 = vcmask (!%p191_p9), 1043456  }
   0xe   : > { %194 = sbr.rel (%p191_p9) target bundleno = 1479 (0x5c7), region = 40  ;;  %v240_v2 = vpack.c.bf16 (!%p191_p9), %v229_v1, %v228_v0  ;;  %v231_v10 = vld [vmem:[%s2785_s1 + $0x18] sm:$0xff] (!%p191_p9)  ;;  %v232_v11 = vld [vmem:[%s2785_s1 + $0x20] sm:$0xff] (!%p191_p9)  ;;  %v233_v12 = vld [vmem:[%s2785_s1 + $0x28] sm:$0xff] (!%p191_p9)  ;;  %vm508_vm2 = vcmask (!%p191_p9), 64512   ;;  %vm862_vm3 = vcmask (!%p191_p9), 523264  }
   0xf   : > { %v241_v13 = vpack.c.bf16 (!%p191_p9), %v231_v10, %v230_v9  ;;  %v242_v14 = vpack.c.bf16 (!%p191_p9), %v233_v12, %v232_v11  ;;  %v234_v15 = vld [vmem:[%s2785_s1 + $0x30] sm:$0xff] (!%p191_p9)  ;;  %v235_v16 = vld [vmem:[%s2785_s1 + $0x38] sm:$0xff] (!%p191_p9)  ;;  %v248_v18 = vld [vmem:[%s2786_s2] sm:$0xff] (!%p191_p9)  ;;  %vm2113_vm4 = vmmov (!%p191_p9), 0   ;;  %s1663_s14 = sshll.u32 (!%p191_p9), %s2169_s22, 9  ;;  %s2115_s25 = smov (!%p191_p9), [#allocation2]  }
  0x10   : > { %1720 = vmatprep.mubr.msk.bf16.mxu0 (!%p191_p9), %vm260_vm0, %v240_v2  ;;  %v243_v17 = vpack.c.bf16 (!%p191_p9), %v235_v16, %v234_v15  ;;  %v250_v19 = vld [vmem:[%s2786_s2 + $0x10] sm:$0xff] (!%p191_p9)  ;;  %v251_v21 = vld [vmem:[%s2786_s2 + $0x18] sm:$0xff] (!%p191_p9)  ;;  %v252_v31 = vld [vmem:[%s2786_s2 + $0x20] sm:$0xff] (!%p191_p9)  ;;  %s2052_s26 = sshll.u32 (!%p191_p9), %s2115_s25, 4  ;;  %s2053_s26 = int_to_ptr.vmem [resolvable:$false] %s2052_s26 }
  0x11   : > { %v254_v29 = vld [vmem:[%s2786_s2 + $0x30] sm:$0xff] (!%p191_p9)  ;;  %v253_v40 = vld [vmem:[%s2786_s2 + $0x28] sm:$0xff] (!%p191_p9)  ;;  %v236_v46 = vld [vmem:[%s2785_s1 + $0x40] sm:$0xff] (!%p191_p9)  ;;  %s2054_s30 = scalar_lea.vmem (!%p191_p9), %s2053_s26, 1024 }
  0x12   : > { %v249_v44 = vld [vmem:[%s2786_s2 + $0x8] sm:$0xff] (!%p191_p9)  ;;  %v238_v49 = vld [vmem:[%s2785_s1 + $0x50] sm:$0xff] (!%p191_p9)  ;;  %v239_v50 = vld [vmem:[%s2785_s1 + $0x58] sm:$0xff] (!%p191_p9) }
  0x13   : > { %v237_v47 = vld [vmem:[%s2785_s1 + $0x48] sm:$0xff] (!%p191_p9)  ;;  %v245_v51 = vpack.c.bf16 (!%p191_p9), %v239_v50, %v238_v49  ;;  %v255_v56 = vld [vmem:[%s2786_s2 + $0x38] sm:$0xff] (!%p191_p9) }
  0x14   : > { %v244_v48 = vpack.c.bf16 (!%p191_p9), %v237_v47, %v236_v46 }
  0x15   : > { %s219_s9 = scalar_select %p218_p10, %s2169_s22, 1 }
  0x16   : > { %s2738_s22 = scalar_lea.hbm %s2789_s5, %s1663_s14 }
  0x17   : > { %s1662_s10 = sshll.u32 %s219_s9, 5 }
  0x18   : > { %s222_s13 = scalar_lea.vmem %s2784_s0, %s1662_s10  ;;  %s215_s10 = sand.u32 1, %s2102_s19  }
  0x19   : > { %v224_v3 = vld [vmem:[%s222_s13] sm:$0xff]  ;;  %v225_v4 = vld [vmem:[%s222_s13 + $0x8] sm:$0xff]  ;;  %v226_v5 = vld [vmem:[%s222_s13 + $0x10] sm:$0xff]  ;;  %s1626_s11 = sshll.u32 %s215_s10, 5  ;;  %s2743_s17 = scalar_lea.sflag [#allocation3], %s215_s10 }
  0x1a   : > { %v246_v6 = vpack.c.bf16 %v225_v4, %v224_v3  ;;  %v227_v7 = vld [vmem:[%s222_s13 + $0x18] sm:$0xff]  ;;  %s217_s12 = scalar_lea.vmem [#allocation2], %s1626_s11 }
  0x1b   : > { %v247_v8 = vpack.c.bf16 %v227_v7, %v226_v5  ;;  %s1560_s13 = sshll.u32 %s217_s12, 4  ;;  %s2733_s13 = int_to_ptr.vmem [resolvable:$true] %s1560_s13 }
  0x1c   : > { %1716 = vmatprep.subr.bf16.mxu0 %v246_v6  ;;  %s2048_s23 = scalar_lea.vmem %s2733_s13, 512  ;;  %p2055_p0 = scmp.lt.s32.totalorder %s2733_s13, %s2053_s26 }
  0x1d   : > { %1717 = vmatpush3.bf16.msra.mxu0 %v246_v6  ;;  %p2049_p11 = scmp.ne.s32.totalorder %s2733_s13, %s2048_s23  ;;  %p2056_p1 = scmp.lt.s32.totalorder %s2054_s30, %s2048_s23 }
  0x1e   : > { %1718 = vmatprep.subr.bf16.mxu0 %v247_v8 }
  0x1f   : > { %p2050_p12 = pnand %p2049_p11, %p2186_p5  ;;  %p2057_p2 = por %p2056_p1, %p2055_p0 }
  0x21   : > { %1719 = vmatpush3.bf16.msra.mxu0 %v247_v8  ;;  %p2051_p13 = pneg %p2050_p12 }
  0x23   : > { %p2058_p3 = pnand %p2057_p2, %p2051_p13 }
  0x24   : > { %1721 = vmatmul.mubr.msk.bf16.vlgmr.msra.gmra.mrb[0].mxu0 %vm260_vm0, %v241_v13 }
  0x25   : > { %1724 = vmatprep.mubr.msk.bf16.mxu0 %vm260_vm0, %v242_v14 }
  0x2c   : > { %1725 = vmatmul.mubr.msk.bf16.gmra.mrb[4].mxu0 %vm260_vm0, %v243_v17 }
  0x2d   : > { %1728 = vmatprep.mubr.msk.bf16.mxu0 %vm260_vm0, %v244_v48 }
  0x34   : > { %1729 = vmatmul.mubr.msk.bf16.gmra.mrb[8].mxu0 %vm260_vm0, %v245_v51 }
  0xf7   : > { %v1722_v20 = vpop.f32.mrb[0].mxu0 }
  0xf8   : > { %v313_v22 = vpop.f32.mrb[1].mxu0  ;;  %v322_v25 = vadd.f32 %v1722_v20, %v250_v19 }
  0xf9   : > { %v1723_v23 = vpop.f32.mrb[2].mxu0  ;;  %v314_v24 = vadd.f32 %v313_v22, %v248_v18 }
  0xfa   : > { %v325_v26 = vadd.f32 %v1723_v23, %v251_v21  ;;  %v316_v27 = vpop.f32.mrb[3].mxu0 }
  0xfb   : > { %360 = vxpose.xlu0.b32.start.end [1/1] (short) (narrow) %v314_v24, 64  ;;  %v317_v45 = vadd.f32 %v316_v27, %v249_v44 }
  0xfc   : > { %v1876_v28 = vpack.i.bf16 %v325_v26, %v322_v25 }
  0xfe   : > { %1877 = vxpose.xlu1.b32.start.end [1/1] (short) (narrow) %v1876_v28, 64 }
  0xff   : > { %v1726_v30 = vpop.f32.mrb[4].mxu0 }
 0x100   : > { %v338_v32 = vadd.f32 %v1726_v30, %v254_v29  ;;  %v329_v33 = vpop.f32.mrb[5].mxu0 }
 0x101   : > { %v330_v34 = vadd.f32 %v329_v33, %v252_v31  ;;  %v1727_v39 = vpop.f32.mrb[6].mxu0 }
 0x102   : > { %v506_v35 = vpack.c.bf16 %v338_v32, %v338_v32  ;;  %v332_v41 = vpop.f32.mrb[7].mxu0  ;;  %v341_v61 = vadd.f32 %v1727_v39, %v255_v56 }
 0x103   : > { %v504_v36 = vpack.c.bf16 %v330_v34, %v330_v34  ;;  %v333_v42 = vadd.f32 %v332_v41, %v253_v40 }
 0x104   : > { %v683_v37 = vsel %vm521_vm1, %v506_v35, 0  ;;  %1830 = vmatprep.subr.msk.bf16.mxu0 %vm521_vm1, %v506_v35  ;;  %v507_v2 = vpack.c.bf16 %v341_v61, %v341_v61 }
 0x105   : > { %1828 = vmatprep.subr.msk.bf16.mxu1 %vm521_vm1, %v504_v36  ;;  %v523_v38 = vsel %vm521_vm1, %v504_v36, 0  ;;  %1753 = vmatpush3.bf16.msra.mxu0 %v683_v37  ;;  %v505_v43 = vpack.c.bf16 %v333_v42, %v333_v42 }
 0x106   : > { %1733 = vmatpush3.bf16.msra.mxu1 %v523_v38  ;;  %v763_v30 = vsel %vm521_vm1, %v507_v2, 0 }
 0x107   : > { %1829 = vmatprep.subr.msk.bf16.mxu1 %vm521_vm1, %v505_v43  ;;  %v603_v3 = vsel %vm521_vm1, %v505_v43, 0  ;;  %v2295_v49 = vpop.f32.mrb[8].mxu0 }
 0x108   : > { %v2297_v50 = vpop.f32.mrb[9].mxu0 }
 0x109   : > { %v2299_v51 = vpop.f32.mrb[10].mxu0 }
 0x118   : > { %392 = vxpose.xlu0.b32.start.end [1/1] (short) (narrow) %v317_v45, 64 }
 0x17b   : > { %v376_v52 = vpop.trf.xlu0 }
 0x17e   : > { %v2269_v53 = vpop.trf.xlu1 }
 0x17f   : > { %v377_v54 = vpop.trf.xlu0  ;;  %v1879_v57 = vunpack.i.l.bf16 %v2269_v53  ;;  %v1882_v34 = vunpack.i.h.bf16 %v2269_v53 }
 0x180   : > { %v488_v55 = vpack.c.bf16 %v377_v54, %v376_v52  ;;  %v2301_v52 = vpop.f32.mrb[11].mxu0 }
 0x182   : > { %1734 = vmatprep.mubr.msk.bf16.mxu1 %vm508_vm2, %v488_v55  ;;  %v1883_v58 = vpop.trf.xlu1 }
 0x183   : > { %v378_v59 = vpop.trf.xlu0  ;;  %v1884_v60 = vunpack.i.l.bf16 %v1883_v58  ;;  %v1887_v36 = vunpack.i.h.bf16 %v1883_v58 }
 0x185   : > { %v496_v62 = vpack.c.bf16 %v1884_v60, %v1879_v57  ;;  %v500_v38 = vpack.c.bf16 %v1887_v36, %v1882_v34 }
 0x186   : > { %v1888_v63 = vpop.trf.xlu1 }
 0x187   : > { %v379_v0 = vpop.trf.xlu0  ;;  %1754 = vmatprep.mubr.msk.bf16.mxu0 %vm508_vm2, %v496_v62  ;;  %v1889_v4 = vunpack.i.l.bf16 %v1888_v63  ;;  %v1892_v40 = vunpack.i.h.bf16 %v1888_v63 }
 0x188   : > { %v489_v1 = vpack.c.bf16 %v379_v0, %v378_v59 }
 0x18a   : > { %1735 = vmatmul.mubr.msk.bf16.vlgmr.msra.gmra.mrb[0].mxu1 %vm508_vm2, %v489_v1  ;;  %v1893_v5 = vpop.trf.xlu1 }
 0x18b   : > { %v380_v6 = vpop.trf.xlu0  ;;  %1743 = vmatpush3.bf16.msra.mxu1 %v603_v3  ;;  %v1894_v7 = vunpack.i.l.bf16 %v1893_v5  ;;  %v1897_v41 = vunpack.i.h.bf16 %v1893_v5 }
 0x18c   : > { %1831 = vmatprep.subr.msk.bf16.mxu1 %vm521_vm1, %v507_v2 }
 0x18d   : > { %v497_v8 = vpack.c.bf16 %v1894_v7, %v1889_v4  ;;  %v501_v44 = vpack.c.bf16 %v1897_v41, %v1892_v40 }
 0x18e   : > { %v1898_v9 = vpop.trf.xlu1 }
 0x18f   : > { %v381_v10 = vpop.trf.xlu0  ;;  %1755 = vmatmul.mubr.msk.bf16.vlgmr.msra.gmra.mrb[12].mxu0 %vm508_vm2, %v497_v8  ;;  %v1899_v12 = vunpack.i.l.bf16 %v1898_v9  ;;  %v1902_v42 = vunpack.i.h.bf16 %v1898_v9 }
 0x190   : > { %v490_v11 = vpack.c.bf16 %v381_v10, %v380_v6 }
 0x192   : > { %1738 = vmatprep.mubr.msk.bf16.mxu1 %vm508_vm2, %v490_v11  ;;  %v1903_v13 = vpop.trf.xlu1 }
 0x193   : > { %v382_v14 = vpop.trf.xlu0  ;;  %v1904_v15 = vunpack.i.l.bf16 %v1903_v13  ;;  %v1907_v43 = vunpack.i.h.bf16 %v1903_v13 }
 0x195   : > { %v498_v16 = vpack.c.bf16 %v1904_v15, %v1899_v12  ;;  %v502_v45 = vpack.c.bf16 %v1907_v43, %v1902_v42 }
 0x196   : > { %v1908_v17 = vpop.trf.xlu1 }
 0x197   : > { %v383_v18 = vpop.trf.xlu0  ;;  %1758 = vmatprep.mubr.msk.bf16.mxu0 %vm508_vm2, %v498_v16  ;;  %v1909_v20 = vunpack.i.l.bf16 %v1908_v17  ;;  %v1912_v46 = vunpack.i.h.bf16 %v1908_v17 }
 0x198   : > { %v491_v19 = vpack.c.bf16 %v383_v18, %v382_v14 }
 0x19a   : > { %1739 = vmatmul.mubr.msk.bf16.gmra.mrb[4].mxu1 %vm508_vm2, %v491_v19  ;;  %v1913_v21 = vpop.trf.xlu1 }
 0x19b   : > { %v408_v22 = vpop.trf.xlu0  ;;  %v1914_v23 = vunpack.i.l.bf16 %v1913_v21  ;;  %v1917_v47 = vunpack.i.h.bf16 %v1913_v21 }
 0x19d   : > { %v499_v24 = vpack.c.bf16 %v1914_v23, %v1909_v20  ;;  %v503_v48 = vpack.c.bf16 %v1917_v47, %v1912_v46 }
 0x19f   : > { %v409_v25 = vpop.trf.xlu0  ;;  %1759 = vmatmul.mubr.msk.bf16.gmra.mrb[16].mxu0 %vm508_vm2, %v499_v24 }
 0x1a0   : > { %v492_v26 = vpack.c.bf16 %v409_v25, %v408_v22 }
 0x1a2   : > { %1744 = vmatprep.mubr.msk.bf16.mxu1 %vm508_vm2, %v492_v26 }
 0x1a3   : > { %v410_v27 = vpop.trf.xlu0 }
 0x1a7   : > { %v411_v28 = vpop.trf.xlu0 }
 0x1a8   : > { %v493_v29 = vpack.c.bf16 %v411_v28, %v410_v27 }
 0x1aa   : > { %1745 = vmatmul.mubr.msk.bf16.vlgmr.msra.gmra.mrb[8].mxu1 %vm508_vm2, %v493_v29 }
 0x1ab   : > { %1763 = vmatpush3.bf16.msra.mxu1 %v763_v30  ;;  %v412_v31 = vpop.trf.xlu0 }
 0x1af   : > { %v413_v32 = vpop.trf.xlu0 }
 0x1b0   : > { %v494_v33 = vpack.c.bf16 %v413_v32, %v412_v31 }
 0x1b2   : > { %1748 = vmatprep.mubr.msk.bf16.mxu1 %vm508_vm2, %v494_v33 }
 0x1b3   : > { %v414_v35 = vpop.trf.xlu0 }
 0x1b7   : > { %v415_v37 = vpop.trf.xlu0 }
 0x1b8   : > { %v495_v39 = vpack.c.bf16 %v415_v37, %v414_v35 }
 0x1ba   : > { %1749 = vmatmul.mubr.msk.bf16.gmra.mrb[12].mxu1 %vm508_vm2, %v495_v39 }
 0x1bb   : > { %1764 = vmatprep.mubr.msk.bf16.mxu1 %vm508_vm2, %v500_v38 }
 0x1c2   : > { %1765 = vmatmul.mubr.msk.bf16.vlgmr.msra.gmra.mrb[16].mxu1 %vm508_vm2, %v501_v44 }
 0x1c3   : > { %1768 = vmatprep.mubr.msk.bf16.mxu1 %vm508_vm2, %v502_v45 }
 0x1ca   : > { %1769 = vmatmul.mubr.msk.bf16.gmra.mrb[20].mxu1 %vm508_vm2, %v503_v48 }
 0x25d   : > { %v1736_v53 = vpop.f32.mrb[0].mxu1 }
 0x25e   : > { %v559_v54 = vpop.f32.mrb[1].mxu1  ;;  %v2305_v58 = vmul.f32 0.35355338, %v1736_v53 }
 0x25f   : > { %v2303_v55 = vmul.f32 0.35355338, %v559_v54  ;;  %v1737_v56 = vpop.f32.mrb[2].mxu1 }
 0x260   : > { %v562_v57 = vpop.f32.mrb[3].mxu1  ;;  %v2319_v1 = vmul.f32 0.35355338, %v1737_v56  ;;  %v869_v2 = vsel %vm862_vm3, %v2305_v58, -inf }
 0x261   : > { %v2307_v59 = vmul.f32 0.35355338, %v562_v57  ;;  %v863_v60 = vsel %vm862_vm3, %v2303_v55, -inf }
 0x262   : > { %864 = vmax.xlane.f32.xlu1 %v863_v60  ;;  %v2311_v61 = vpop.f32.mrb[12].mxu0  ;;  %v872_v4 = vsel %vm862_vm3, %v2319_v1, -inf }
 0x263   : > { %v866_v62 = vsel %vm862_vm3, %v2307_v59, -inf  ;;  %v2315_v63 = vpop.f32.mrb[13].mxu0 }
 0x264   : > { %867 = vmax.xlane.f32.xlu0 %v866_v62  ;;  %v2317_v0 = vpop.f32.mrb[14].mxu0  ;;  %v2386_v62 = vmul.f32 0.35355338, %v2315_v63 }
 0x265   : > { %v722_v3 = vpop.f32.mrb[15].mxu0 }
 0x266   : > { %870 = vmax.xlane.f32.xlu1 %v869_v2  ;;  %v2373_v45 = vmul.f32 0.35355338, %v722_v3 }
 0x268   : > { %v914_v57 = vsel %vm862_vm3, %v2373_v45, -inf }
 0x26a   : > { %873 = vmax.xlane.f32.xlu1 %v872_v4  ;;  %v2391_v4 = vmul.f32 0.35355338, %v2317_v0 }
 0x26d   : > { %v1740_v5 = vpop.f32.mrb[4].mxu1 }
 0x26e   : > { %v575_v6 = vpop.f32.mrb[5].mxu1  ;;  %v2369_v42 = vmul.f32 0.35355338, %v1740_v5 }
 0x26f   : > { %v1741_v7 = vpop.f32.mrb[6].mxu1  ;;  %v2347_v24 = vmul.f32 0.35355338, %v575_v6 }
 0x270   : > { %v578_v8 = vpop.f32.mrb[7].mxu1  ;;  %v2357_v33 = vmul.f32 0.35355338, %v1741_v7  ;;  %v881_v48 = vsel %vm862_vm3, %v2369_v42, -inf  ;;  %v911_v7 = vsel %vm862_vm3, %v2386_v62, -inf }
 0x271   : > { %v2351_v29 = vmul.f32 0.35355338, %v578_v8  ;;  %v875_v31 = vsel %vm862_vm3, %v2347_v24, -inf  ;;  %v920_v8 = vsel %vm862_vm3, %v2391_v4, -inf }
 0x272   : > { %v2325_v9 = vpop.f32.mrb[16].mxu0  ;;  %v884_v40 = vsel %vm862_vm3, %v2357_v33, -inf }
 0x273   : > { %v2327_v10 = vpop.f32.mrb[17].mxu0  ;;  %v878_v36 = vsel %vm862_vm3, %v2351_v29, -inf }
 0x274   : > { %v2329_v11 = vpop.f32.mrb[18].mxu0 }
 0x275   : > { %v2331_v12 = vpop.f32.mrb[19].mxu0 }
 0x27d   : > { %v1746_v13 = vpop.f32.mrb[8].mxu1 }
 0x27e   : > { %v2333_v14 = vmul.f32 0.35355338, %v1746_v13  ;;  %v639_v15 = vpop.f32.mrb[9].mxu1  ;;  %v2404_v13 = vmul.f32 0.35355338, %v2311_v61 }
 0x27f   : > { %v1747_v16 = vpop.f32.mrb[10].mxu1  ;;  %v2335_v17 = vmul.f32 0.35355338, %v639_v15  ;;  %v2409_v15 = vmul.f32 0.35355338, %v2331_v12 }
 0x280   : > { %v642_v18 = vpop.f32.mrb[11].mxu1  ;;  %v893_v19 = vsel %vm862_vm3, %v2333_v14, -inf  ;;  %v2343_v22 = vmul.f32 0.35355338, %v1747_v16 }
 0x281   : > { %894 = vmax.xlane.f32.xlu1 %v893_v19  ;;  %v2339_v20 = vmul.f32 0.35355338, %v642_v18  ;;  %v887_v21 = vsel %vm862_vm3, %v2335_v17, -inf  ;;  %v917_v19 = vsel %vm862_vm3, %v2404_v13, -inf }
 0x282   : > { %v896_v25 = vsel %vm862_vm3, %v2343_v22, -inf }
 0x283   : > { %v890_v23 = vsel %vm862_vm3, %v2339_v20, -inf }
 0x285   : > { %888 = vmax.xlane.f32.xlu1 %v887_v21  ;;  %v926_v21 = vsel %vm862_vm3, %v2409_v15, -inf }
 0x289   : > { %891 = vmax.xlane.f32.xlu1 %v890_v23  ;;  %v2422_v23 = vmul.f32 0.35355338, %v2327_v10 }
 0x28d   : > { %897 = vmax.xlane.f32.xlu1 %v896_v25  ;;  %v1750_v26 = vpop.f32.mrb[12].mxu1  ;;  %v2427_v25 = vmul.f32 0.35355338, %v2329_v11 }
 0x28e   : > { %v655_v27 = vpop.f32.mrb[13].mxu1  ;;  %v2377_v47 = vmul.f32 0.35355338, %v1750_v26 }
 0x28f   : > { %v1751_v28 = vpop.f32.mrb[14].mxu1  ;;  %v2361_v35 = vmul.f32 0.35355338, %v655_v27 }
 0x290   : > { %v658_v30 = vpop.f32.mrb[15].mxu1  ;;  %v2365_v39 = vmul.f32 0.35355338, %v1751_v28  ;;  %v905_v2 = vsel %vm862_vm3, %v2377_v47, -inf  ;;  %v923_v28 = vsel %vm862_vm3, %v2422_v23, -inf }
 0x291   : > { %v2355_v32 = vmul.f32 0.35355338, %v658_v30  ;;  %876 = vmax.xlane.f32.xlu1 %v875_v31  ;;  %v899_v43 = vsel %vm862_vm3, %v2361_v35, -inf  ;;  %v932_v30 = vsel %vm862_vm3, %v2427_v25, -inf  ;;  %v2440_v31 = vmul.f32 0.35355338, %v2325_v9 }
 0x292   : > { %v908_v46 = vsel %vm862_vm3, %v2365_v39, -inf }
 0x293   : > { %v902_v34 = vsel %vm862_vm3, %v2355_v32, -inf }
 0x294   : > { %903 = vmax.xlane.f32.xlu0 %v902_v34 }
 0x295   : > { %879 = vmax.xlane.f32.xlu1 %v878_v36  ;;  %v1766_v37 = vpop.f32.mrb[16].mxu1 }
 0x296   : > { %v799_v38 = vpop.f32.mrb[17].mxu1  ;;  %v2413_v18 = vmul.f32 0.35355338, %v1766_v37  ;;  %v929_v37 = vsel %vm862_vm3, %v2440_v31, -inf }
 0x297   : > { %v1767_v41 = vpop.f32.mrb[18].mxu1  ;;  %v2395_v6 = vmul.f32 0.35355338, %v799_v38 }
 0x298   : > { %885 = vmax.xlane.f32.xlu0 %v884_v40  ;;  %v802_v44 = vpop.f32.mrb[19].mxu1  ;;  %v2399_v63 = vmul.f32 0.35355338, %v1767_v41  ;;  %v941_v12 = vsel %vm862_vm3, %v2413_v18, -inf }
 0x299   : > { %900 = vmax.xlane.f32.xlu1 %v899_v43  ;;  %v2381_v56 = vmul.f32 0.35355338, %v802_v44  ;;  %v935_v0 = vsel %vm862_vm3, %v2395_v6, -inf }
 0x29a   : > { %v944_v16 = vsel %vm862_vm3, %v2399_v63, -inf }
 0x29b   : > { %v938_v5 = vsel %vm862_vm3, %v2381_v56, -inf }
 0x29c   : > { %909 = vmax.xlane.f32.xlu0 %v908_v46 }
 0x29d   : > { %882 = vmax.xlane.f32.xlu1 %v881_v48  ;;  %v1770_v53 = vpop.f32.mrb[20].mxu1 }
 0x29e   : > { %v815_v54 = vpop.f32.mrb[21].mxu1  ;;  %v2446_v36 = vmul.f32 0.35355338, %v1770_v53 }
 0x29f   : > { %v1771_v60 = vpop.f32.mrb[22].mxu1  ;;  %v2431_v27 = vmul.f32 0.35355338, %v815_v54 }
 0x2a0   : > { %915 = vmax.xlane.f32.xlu0 %v914_v57  ;;  %v818_v3 = vpop.f32.mrb[23].mxu1  ;;  %v2435_v10 = vmul.f32 0.35355338, %v1771_v60  ;;  %v953_v38 = vsel %vm862_vm3, %v2446_v36, -inf }
 0x2a1   : > { %906 = vmax.xlane.f32.xlu1 %v905_v2  ;;  %v2417_v61 = vmul.f32 0.35355338, %v818_v3  ;;  %v947_v11 = vsel %vm862_vm3, %v2431_v27, -inf  ;;  %v2112_v3 = vmov 0.0  }
 0x2a2   : > { %v956_v34 = vsel %vm862_vm3, %v2435_v10, -inf  ;;  %1772 = vmatprep.subr.bf16.mxu0 %v2112_v3  ;;  %1784 = vmatprep.subr.bf16.mxu1 %v2112_v3 }
 0x2a3   : > { %v950_v26 = vsel %vm862_vm3, %v2417_v61, -inf  ;;  %1780 = vmatprep.mubr.msk.bf16.mxu0 %vm2113_vm4, %v2112_v3  ;;  %1792 = vmatprep.mubr.msk.bf16.mxu1 %vm2113_vm4, %v2112_v3 }
 0x2a4   : > { %939 = vmax.xlane.f32.xlu0 %v938_v5 }
 0x2a5   : > { %912 = vmax.xlane.f32.xlu1 %v911_v7 }
 0x2a8   : > { %921 = vmax.xlane.f32.xlu0 %v920_v8 }
 0x2a9   : > { %936 = vmax.xlane.f32.xlu1 %v935_v0 }
 0x2ac   : > { %945 = vmax.xlane.f32.xlu0 %v944_v16 }
 0x2ad   : > { %918 = vmax.xlane.f32.xlu1 %v917_v19 }
 0x2b0   : > { %927 = vmax.xlane.f32.xlu0 %v926_v21 }
 0x2b1   : > { %942 = vmax.xlane.f32.xlu1 %v941_v12 }
 0x2b4   : > { %951 = vmax.xlane.f32.xlu0 %v950_v26 }
 0x2b5   : > { %924 = vmax.xlane.f32.xlu1 %v923_v28 }
 0x2b8   : > { %933 = vmax.xlane.f32.xlu0 %v932_v30 }
 0x2b9   : > { %948 = vmax.xlane.f32.xlu1 %v947_v11 }
 0x2bc   : > { %957 = vmax.xlane.f32.xlu0 %v956_v34 }
 0x2bd   : > { %930 = vmax.xlane.f32.xlu1 %v929_v37 }
 0x2c1   : > { %954 = vmax.xlane.f32.xlu1 %v953_v38 }
 0x2ef   : > { %v865_v9 = vpop.xlane.xlu1 %864 }
 0x2f0   : > { %v959_v40 = vsub.f32 %v2303_v55, %v865_v9 }
 0x2f1   : > { %v868_v41 = vpop.xlane.xlu0 %867 }
 0x2f2   : > { %v991_v43 = vmul.f32 1.442695, %v959_v40  ;;  %v960_v44 = vsub.f32 %v2307_v59, %v868_v41 }
 0x2f3   : > { %v871_v55 = vpop.xlane.xlu1 %870 }
 0x2f4   : > { %1920 = vpow2.f32 %v991_v43  ;;  %v993_v46 = vmul.f32 1.442695, %v960_v44  ;;  %v961_v59 = vsub.f32 %v2305_v58, %v871_v55 }
 0x2f6   : > { %1922 = vpow2.f32 %v993_v46  ;;  %v995_v0 = vmul.f32 1.442695, %v961_v59 }
 0x2f7   : > { %v874_v60 = vpop.xlane.xlu1 %873 }
 0x2f8   : > { %v962_v8 = vsub.f32 %v2319_v1, %v874_v60 }
 0x2fa   : > { %v997_v26 = vmul.f32 1.442695, %v962_v8 }
 0x2fe   : > { %v2454_v48 = vpop.eup %1920 }
 0x2ff   : > { %v1055_v53 = vsel %vm862_vm3, %v2454_v48, 0.0 }
 0x300   : > { %v2458_v54 = vpop.eup %1922  ;;  %1056 = vadd.xlane.f32.xlu1 %v1055_v53 }
 0x301   : > { %v1058_v57 = vsel %vm862_vm3, %v2458_v54, 0.0 }
 0x302   : > { %1059 = vadd.xlane.f32.xlu0 %v1058_v57 }
 0x30e   : > { %v895_v2 = vpop.xlane.xlu1 %894 }
 0x30f   : > { %v969_v16 = vsub.f32 %v2333_v14, %v895_v2 }
 0x311   : > { %v1011_v58 = vmul.f32 1.442695, %v969_v16 }
 0x312   : > { %v889_v5 = vpop.xlane.xlu1 %888 }
 0x313   : > { %v967_v7 = vsub.f32 %v2335_v17, %v889_v5 }
 0x315   : > { %v1007_v19 = vmul.f32 1.442695, %v967_v7 }
 0x316   : > { %v892_v21 = vpop.xlane.xlu1 %891 }
 0x317   : > { %1924 = vpow2.f32 %v1007_v19  ;;  %v968_v12 = vsub.f32 %v2339_v20, %v892_v21 }
 0x318   : > { %1926 = vpow2.f32 %v995_v0 }
 0x319   : > { %v1009_v28 = vmul.f32 1.442695, %v968_v12 }
 0x31a   : > { %v898_v30 = vpop.xlane.xlu1 %897 }
 0x31b   : > { %1928 = vpow2.f32 %v1009_v28  ;;  %v970_v11 = vsub.f32 %v2343_v22, %v898_v30 }
 0x31c   : > { %1930 = vpow2.f32 %v997_v26 }
 0x31d   : > { %1932 = vpow2.f32 %v1011_v58  ;;  %v1013_v17 = vmul.f32 1.442695, %v970_v11 }
 0x31e   : > { %v877_v1 = vpop.xlane.xlu1 %876 }
 0x31f   : > { %v963_v34 = vsub.f32 %v2347_v24, %v877_v1  ;;  %1934 = vpow2.f32 %v1013_v17 }
 0x321   : > { %v2471_v14 = vpop.eup %1924  ;;  %v999_v37 = vmul.f32 1.442695, %v963_v34  ;;  %v904_v38 = vpop.xlane.xlu0 %903 }
 0x322   : > { %v972_v20 = vsub.f32 %v2355_v32, %v904_v38  ;;  %v880_v9 = vpop.xlane.xlu1 %879  ;;  %v1079_v40 = vsel %vm862_vm3, %v2471_v14, 0.0  ;;  %v2476_v41 = vpop.eup %1926 }
 0x323   : > { %1936 = vpow2.f32 %v999_v37  ;;  %v964_v22 = vsub.f32 %v2351_v29, %v880_v9  ;;  %1080 = vadd.xlane.f32.xlu1 %v1079_v40  ;;  %v1061_v55 = vsel %vm862_vm3, %v2476_v41, 0.0 }
 0x324   : > { %v1017_v24 = vmul.f32 1.442695, %v972_v20 }
 0x325   : > { %v2479_v43 = vpop.eup %1928  ;;  %v1001_v44 = vmul.f32 1.442695, %v964_v22  ;;  %v886_v46 = vpop.xlane.xlu0 %885 }
 0x326   : > { %v2481_v53 = vpop.eup %1930  ;;  %v966_v57 = vsub.f32 %v2357_v33, %v886_v46  ;;  %v901_v32 = vpop.xlane.xlu1 %900  ;;  %v1082_v60 = vsel %vm862_vm3, %v2479_v43, 0.0 }
 0x327   : > { %v2488_v2 = vpop.eup %1932  ;;  %1938 = vpow2.f32 %v1001_v44  ;;  %v971_v29 = vsub.f32 %v2361_v35, %v901_v32  ;;  %1062 = vadd.xlane.f32.xlu1 %v1061_v55  ;;  %1083 = vadd.xlane.f32.xlu0 %v1082_v60  ;;  %v1064_v16 = vsel %vm862_vm3, %v2481_v53, 0.0 }
 0x328   : > { %1940 = vpow2.f32 %v1017_v24  ;;  %v1005_v59 = vmul.f32 1.442695, %v966_v57  ;;  %v1085_v0 = vsel %vm862_vm3, %v2488_v2, 0.0 }
 0x329   : > { %v1015_v5 = vmul.f32 1.442695, %v971_v29  ;;  %v910_v7 = vpop.xlane.xlu0 %909  ;;  %v2496_v19 = vpop.eup %1934 }
 0x32a   : > { %v974_v33 = vsub.f32 %v2365_v39, %v910_v7  ;;  %v883_v8 = vpop.xlane.xlu1 %882  ;;  %v1088_v11 = vsel %vm862_vm3, %v2496_v19, 0.0 }
 0x32b   : > { %1942 = vpow2.f32 %v1015_v5  ;;  %v965_v35 = vsub.f32 %v2369_v42, %v883_v8  ;;  %1086 = vadd.xlane.f32.xlu1 %v1085_v0  ;;  %1065 = vadd.xlane.f32.xlu0 %v1064_v16 }
 0x32c   : > { %1944 = vpow2.f32 %v1005_v59  ;;  %v1021_v12 = vmul.f32 1.442695, %v974_v33 }
 0x32d   : > { %v2499_v21 = vpop.eup %1936  ;;  %v1003_v26 = vmul.f32 1.442695, %v965_v35  ;;  %v916_v39 = vpop.xlane.xlu0 %915 }
 0x32e   : > { %v976_v58 = vsub.f32 %v2373_v45, %v916_v39  ;;  %v907_v28 = vpop.xlane.xlu1 %906  ;;  %v1067_v30 = vsel %vm862_vm3, %v2499_v21, 0.0 }
 0x32f   : > { %1946 = vpow2.f32 %v1003_v26  ;;  %v973_v42 = vsub.f32 %v2377_v47, %v907_v28  ;;  %1068 = vadd.xlane.f32.xlu1 %v1067_v30  ;;  %1089 = vadd.xlane.f32.xlu0 %v1088_v11 }
 0x330   : > { %1948 = vpow2.f32 %v1021_v12  ;;  %v1025_v1 = vmul.f32 1.442695, %v976_v58 }
 0x331   : > { %v2507_v17 = vpop.eup %1938  ;;  %v1019_v34 = vmul.f32 1.442695, %v973_v42  ;;  %v940_v37 = vpop.xlane.xlu0 %939 }
 0x332   : > { %v984_v45 = vsub.f32 %v2381_v56, %v940_v37  ;;  %v913_v38 = vpop.xlane.xlu1 %912  ;;  %v1070_v20 = vsel %vm862_vm3, %v2507_v17, 0.0  ;;  %v2512_v9 = vpop.eup %1940 }
 0x333   : > { %1950 = vpow2.f32 %v1019_v34  ;;  %v975_v40 = vsub.f32 %v2386_v62, %v913_v38  ;;  %1071 = vadd.xlane.f32.xlu0 %v1070_v20  ;;  %v1094_v32 = vsel %vm862_vm3, %v2512_v9, 0.0 }
 0x334   : > { %1952 = vpow2.f32 %v1025_v1  ;;  %v1041_v22 = vmul.f32 1.442695, %v984_v45 }
 0x335   : > { %v2515_v47 = vpop.eup %1942  ;;  %v1023_v24 = vmul.f32 1.442695, %v975_v40  ;;  %v922_v44 = vpop.xlane.xlu0 %921 }
 0x336   : > { %v978_v46 = vsub.f32 %v2391_v4, %v922_v44  ;;  %v937_v57 = vpop.xlane.xlu1 %936  ;;  %v1091_v56 = vsel %vm862_vm3, %v2515_v47, 0.0  ;;  %v2522_v55 = vpop.eup %1944 }
 0x337   : > { %1954 = vpow2.f32 %v1023_v24  ;;  %v983_v62 = vsub.f32 %v2395_v6, %v937_v57  ;;  %1092 = vadd.xlane.f32.xlu1 %v1091_v56  ;;  %1095 = vadd.xlane.f32.xlu0 %v1094_v32  ;;  %v1076_v8 = vsel %vm862_vm3, %v2522_v55, 0.0 }
 0x338   : > { %1956 = vpow2.f32 %v1041_v22  ;;  %v1029_v29 = vmul.f32 1.442695, %v978_v46 }
 0x339   : > { %v2525_v60 = vpop.eup %1946  ;;  %v1039_v59 = vmul.f32 1.442695, %v983_v62  ;;  %v946_v4 = vpop.xlane.xlu0 %945 }
 0x33a   : > { %v986_v5 = vsub.f32 %v2399_v63, %v946_v4  ;;  %v919_v7 = vpop.xlane.xlu1 %918  ;;  %v1073_v33 = vsel %vm862_vm3, %v2525_v60, 0.0  ;;  %v2532_v0 = vpop.eup %1948 }
 0x33b   : > { %1958 = vpow2.f32 %v1039_v59  ;;  %v977_v6 = vsub.f32 %v2404_v13, %v919_v7  ;;  %1074 = vadd.xlane.f32.xlu1 %v1073_v33  ;;  %1077 = vadd.xlane.f32.xlu0 %v1076_v8  ;;  %v1100_v28 = vsel %vm862_vm3, %v2532_v0, 0.0 }
 0x33c   : > { %1960 = vpow2.f32 %v1029_v29  ;;  %v1045_v35 = vmul.f32 1.442695, %v986_v5 }
 0x33d   : > { %v2535_v16 = vpop.eup %1950  ;;  %v1027_v12 = vmul.f32 1.442695, %v977_v6  ;;  %v928_v63 = vpop.xlane.xlu0 %927 }
 0x33e   : > { %v980_v26 = vsub.f32 %v2409_v15, %v928_v63  ;;  %v943_v39 = vpop.xlane.xlu1 %942  ;;  %v1097_v58 = vsel %vm862_vm3, %v2535_v16, 0.0  ;;  %v2542_v30 = vpop.eup %1952 }
 0x33f   : > { %1962 = vpow2.f32 %v1027_v12  ;;  %v985_v13 = vsub.f32 %v2413_v18, %v943_v39  ;;  %1098 = vadd.xlane.f32.xlu1 %v1097_v58  ;;  %1101 = vadd.xlane.f32.xlu0 %v1100_v28  ;;  %v1106_v38 = vsel %vm862_vm3, %v2542_v30, 0.0 }
 0x340   : > { %1964 = vpow2.f32 %v1045_v35  ;;  %v1033_v42 = vmul.f32 1.442695, %v980_v26 }
 0x341   : > { %v2545_v11 = vpop.eup %1954  ;;  %v1043_v1 = vmul.f32 1.442695, %v985_v13  ;;  %v952_v15 = vpop.xlane.xlu0 %951 }
 0x342   : > { %v988_v34 = vsub.f32 %v2417_v61, %v952_v15  ;;  %v925_v37 = vpop.xlane.xlu1 %924  ;;  %v1103_v45 = vsel %vm862_vm3, %v2545_v11, 0.0  ;;  %v2552_v20 = vpop.eup %1956 }
 0x343   : > { %1966 = vpow2.f32 %v1043_v1  ;;  %v979_v18 = vsub.f32 %v2422_v23, %v925_v37  ;;  %1104 = vadd.xlane.f32.xlu1 %v1103_v45  ;;  %1107 = vadd.xlane.f32.xlu0 %v1106_v38  ;;  %v1130_v56 = vsel %vm862_vm3, %v2552_v20, 0.0 }
 0x344   : > { %1968 = vpow2.f32 %v1033_v42  ;;  %v1049_v22 = vmul.f32 1.442695, %v988_v34 }
 0x345   : > { %v2555_v40 = vpop.eup %1958  ;;  %v1031_v24 = vmul.f32 1.442695, %v979_v18  ;;  %v934_v61 = vpop.xlane.xlu0 %933 }
 0x346   : > { %v982_v44 = vsub.f32 %v2427_v25, %v934_v61  ;;  %v949_v46 = vpop.xlane.xlu1 %948  ;;  %v1127_v57 = vsel %vm862_vm3, %v2555_v40, 0.0  ;;  %v2562_v32 = vpop.eup %1960 }
 0x347   : > { %1970 = vpow2.f32 %v1031_v24  ;;  %v987_v23 = vsub.f32 %v2431_v27, %v949_v46  ;;  %1128 = vadd.xlane.f32.xlu1 %v1127_v57  ;;  %1131 = vadd.xlane.f32.xlu0 %v1130_v56  ;;  %v1112_v33 = vsel %vm862_vm3, %v2562_v32, 0.0 }
 0x348   : > { %1972 = vpow2.f32 %v1049_v22  ;;  %v1037_v29 = vmul.f32 1.442695, %v982_v44 }
 0x349   : > { %v2565_v62 = vpop.eup %1962  ;;  %v1047_v59 = vmul.f32 1.442695, %v987_v23  ;;  %v958_v25 = vpop.xlane.xlu0 %957 }
 0x34a   : > { %v990_v4 = vsub.f32 %v2435_v10, %v958_v25  ;;  %v931_v5 = vpop.xlane.xlu1 %930  ;;  %v1109_v7 = vsel %vm862_vm3, %v2565_v62, 0.0  ;;  %v2572_v8 = vpop.eup %1964 }
 0x34b   : > { %1974 = vpow2.f32 %v1047_v59  ;;  %v981_v27 = vsub.f32 %v2440_v31, %v931_v5  ;;  %1110 = vadd.xlane.f32.xlu1 %v1109_v7  ;;  %1113 = vadd.xlane.f32.xlu0 %v1112_v33  ;;  %v1136_v26 = vsel %vm862_vm3, %v2572_v8, 0.0 }
 0x34c   : > { %1976 = vpow2.f32 %v1037_v29  ;;  %v1053_v35 = vmul.f32 1.442695, %v990_v4 }
 0x34d   : > { %v2575_v6 = vpop.eup %1966  ;;  %v1035_v12 = vmul.f32 1.442695, %v981_v27 }
 0x34e   : > { %v955_v10 = vpop.xlane.xlu1 %954  ;;  %v1133_v63 = vsel %vm862_vm3, %v2575_v6, 0.0  ;;  %v2581_v39 = vpop.eup %1968 }
 0x34f   : > { %1978 = vpow2.f32 %v1035_v12  ;;  %v989_v58 = vsub.f32 %v2446_v36, %v955_v10  ;;  %1134 = vadd.xlane.f32.xlu1 %v1133_v63  ;;  %1137 = vadd.xlane.f32.xlu0 %v1136_v26  ;;  %v1118_v42 = vsel %vm862_vm3, %v2581_v39, 0.0 }
 0x350   : > { %1980 = vpow2.f32 %v1053_v35 }
 0x351   : > { %v2584_v31 = vpop.eup %1970  ;;  %v1051_v28 = vmul.f32 1.442695, %v989_v58 }
 0x352   : > { %v1115_v13 = vsel %vm862_vm3, %v2584_v31, 0.0  ;;  %v2590_v1 = vpop.eup %1972 }
 0x353   : > { %1982 = vpow2.f32 %v1051_v28  ;;  %1116 = vadd.xlane.f32.xlu1 %v1115_v13  ;;  %1119 = vadd.xlane.f32.xlu0 %v1118_v42  ;;  %v1142_v34 = vsel %vm862_vm3, %v2590_v1, 0.0 }
 0x355   : > { %v2592_v15 = vpop.eup %1974 }
 0x356   : > { %v1139_v36 = vsel %vm862_vm3, %v2592_v15, 0.0  ;;  %v2598_v37 = vpop.eup %1976 }
 0x357   : > { %1140 = vadd.xlane.f32.xlu1 %v1139_v36  ;;  %1143 = vadd.xlane.f32.xlu0 %v1142_v34  ;;  %v1124_v18 = vsel %vm862_vm3, %v2598_v37, 0.0 }
 0x359   : > { %v2600_v45 = vpop.eup %1978 }
 0x35a   : > { %v1121_v38 = vsel %vm862_vm3, %v2600_v45, 0.0  ;;  %v2606_v22 = vpop.eup %1980 }
 0x35b   : > { %1122 = vadd.xlane.f32.xlu1 %v1121_v38  ;;  %1125 = vadd.xlane.f32.xlu0 %v1124_v18  ;;  %v1148_v44 = vsel %vm862_vm3, %v2606_v22, 0.0 }
 0x35d   : > { %v2608_v24 = vpop.eup %1982 }
 0x35e   : > { %v1145_v61 = vsel %vm862_vm3, %v2608_v24, 0.0 }
 0x35f   : > { %1146 = vadd.xlane.f32.xlu1 %v1145_v61  ;;  %1149 = vadd.xlane.f32.xlu0 %v1148_v44 }
 0x38d   : > { %v1057_v46 = vpop.xlane.xlu1 %1056 }
 0x38e   : > { %1984 = vrcp.f32 %v1057_v46 }
 0x38f   : > { %v1060_v57 = vpop.xlane.xlu0 %1059 }
 0x390   : > { %1986 = vrcp.f32 %v1060_v57 }
 0x398   : > { %v1985_v56 = vpop.eup %1984 }
 0x399   : > { %v1183_v29 = vmul.f32 %v1985_v56, %v2454_v48 }
 0x39a   : > { %v1987_v23 = vpop.eup %1986 }
 0x39b   : > { %v1184_v59 = vmul.f32 %v1987_v23, %v2458_v54 }
 0x39d   : > { %v1219_v25 = vpack.c.bf16 %v1184_v59, %v1183_v29 }
 0x39f   : > { %v1239_v4 = vsel %vm862_vm3, %v1219_v25, 0 }
 0x3a0   : > { %1773 = vmatpush3.bf16.xpose.msra.mxu0 %v1239_v4 }
 0x3a1   : > { %1774 = vmatprep.subr.bf16.mxu0 %v2112_v3 }
 0x3b0   : > { %v1081_v5 = vpop.xlane.xlu1 %1080 }
 0x3b1   : > { %1988 = vrcp.f32 %v1081_v5 }
 0x3b4   : > { %v1063_v7 = vpop.xlane.xlu1 %1062  ;;  %v1084_v33 = vpop.xlane.xlu0 %1083 }
 0x3b5   : > { %1990 = vrcp.f32 %v1084_v33 }
 0x3b6   : > { %1992 = vrcp.f32 %v1063_v7 }
 0x3b8   : > { %v1087_v27 = vpop.xlane.xlu1 %1086  ;;  %v1066_v35 = vpop.xlane.xlu0 %1065 }
 0x3b9   : > { %1994 = vrcp.f32 %v1066_v35 }
 0x3ba   : > { %1996 = vrcp.f32 %v1087_v27 }
 0x3bb   : > { %v1989_v10 = vpop.eup %1988 }
 0x3bc   : > { %v1069_v12 = vpop.xlane.xlu1 %1068  ;;  %v1090_v48 = vpop.xlane.xlu0 %1089  ;;  %v1191_v26 = vmul.f32 %v1989_v10, %v2471_v14 }
 0x3bd   : > { %1998 = vrcp.f32 %v1090_v48 }
 0x3be   : > { %2000 = vrcp.f32 %v1069_v12 }
 0x3bf   : > { %v1991_v54 = vpop.eup %1990 }
 0x3c0   : > { %v1072_v63 = vpop.xlane.xlu0 %1071  ;;  %v1192_v58 = vmul.f32 %v1991_v54, %v2479_v43  ;;  %v1993_v28 = vpop.eup %1992 }
 0x3c1   : > { %2002 = vrcp.f32 %v1072_v63  ;;  %v1185_v18 = vmul.f32 %v1993_v28, %v2476_v41 }
 0x3c2   : > { %v1223_v13 = vpack.c.bf16 %v1192_v58, %v1191_v26 }
 0x3c3   : > { %v1995_v42 = vpop.eup %1994 }
 0x3c4   : > { %v1093_v36 = vpop.xlane.xlu1 %1092  ;;  %v1096_v34 = vpop.xlane.xlu0 %1095  ;;  %v1294_v38 = vsel %vm862_vm3, %v1223_v13, 0  ;;  %v1186_v61 = vmul.f32 %v1995_v42, %v2481_v53 }
 0x3c5   : > { %2004 = vrcp.f32 %v1093_v36  ;;  %v1997_v44 = vpop.eup %1996  ;;  %1785 = vmatpush3.bf16.xpose.msra.mxu1 %v1294_v38 }
 0x3c6   : > { %2006 = vrcp.f32 %v1096_v34  ;;  %v1220_v46 = vpack.c.bf16 %v1186_v61, %v1185_v18  ;;  %1786 = vmatprep.subr.bf16.mxu1 %v2112_v3  ;;  %v1193_v29 = vmul.f32 %v1997_v44, %v2488_v2  ;;  %v256_v34 = vld [vmem:[%s2786_s2 + $0x40] sm:$0xff] }
 0x3c7   : > { %v1999_v14 = vpop.eup %1998 }
 0x3c8   : > { %v1075_v43 = vpop.xlane.xlu1 %1074  ;;  %v1078_v57 = vpop.xlane.xlu0 %1077  ;;  %v1242_v23 = vsel %vm862_vm3, %v1220_v46, 0  ;;  %v1194_v59 = vmul.f32 %v1999_v14, %v2496_v19  ;;  %v346_v46 = vadd.f32 %v2297_v50, %v256_v34 }
 0x3c9   : > { %v2001_v56 = vpop.eup %2000  ;;  %2008 = vrcp.f32 %v1075_v43  ;;  %1775 = vmatpush3.bf16.xpose.msra.mxu0 %v1242_v23 }
 0x3ca   : > { %2010 = vrcp.f32 %v1078_v57  ;;  %v1224_v53 = vpack.c.bf16 %v1194_v59, %v1193_v29  ;;  %1776 = vmatprep.subr.bf16.mxu0 %v2112_v3  ;;  %v1187_v5 = vmul.f32 %v2001_v56, %v2499_v21  ;;  %v257_v57 = vld [vmem:[%s2786_s2 + $0x48] sm:$0xff]  ;;  %v1215_v59 = vpack.c.bf16 %v346_v46, %v346_v46 }
 0x3cb   : > { %v2003_v41 = vpop.eup %2002 }
 0x3cc   : > { %v1099_v25 = vpop.xlane.xlu1 %1098  ;;  %v1102_v4 = vpop.xlane.xlu0 %1101  ;;  %v1188_v7 = vmul.f32 %v2003_v41, %v2507_v17  ;;  %v1297_v33 = vsel %vm862_vm3, %v1224_v53, 0  ;;  %v349_v41 = vadd.f32 %v2301_v52, %v257_v57 }
 0x3cd   : > { %2012 = vrcp.f32 %v1099_v25  ;;  %1787 = vmatpush3.bf16.xpose.msra.mxu1 %v1297_v33 }
 0x3ce   : > { %2014 = vrcp.f32 %v1102_v4  ;;  %v1221_v2 = vpack.c.bf16 %v1188_v7, %v1187_v5  ;;  %1788 = vmatprep.subr.bf16.mxu1 %v2112_v3  ;;  %v1216_v33 = vpack.c.bf16 %v349_v41, %v349_v41  ;;  %v1464_v41 = vld [vmem:[%s2788_s4 + $0x8] sm:$0xff] }
 0x3cf   : > { %v2005_v27 = vpop.eup %2004 }
 0x3d0   : > { %v2007_v19 = vpop.eup %2006  ;;  %v1105_v35 = vpop.xlane.xlu1 %1104  ;;  %v1245_v48 = vsel %vm862_vm3, %v1221_v2, 0  ;;  %v1195_v10 = vmul.f32 %v2005_v27, %v2515_v47 }
 0x3d1   : > { %v1108_v12 = vpop.xlane.xlu0 %1107  ;;  %2016 = vrcp.f32 %v1105_v35  ;;  %v1196_v21 = vmul.f32 %v2007_v19, %v2512_v9  ;;  %1777 = vmatpush3.bf16.xpose.msra.mxu0 %v1245_v48 }
 0x3d2   : > { %2018 = vrcp.f32 %v1108_v12  ;;  %1778 = vmatprep.subr.bf16.mxu0 %v2112_v3 }
 0x3d3   : > { %v2009_v17 = vpop.eup %2008  ;;  %v1225_v54 = vpack.c.bf16 %v1196_v21, %v1195_v10 }
 0x3d4   : > { %v2011_v63 = vpop.eup %2010  ;;  %v1129_v26 = vpop.xlane.xlu1 %1128  ;;  %v1189_v28 = vmul.f32 %v2009_v17, %v2525_v60 }
 0x3d5   : > { %v1132_v58 = vpop.xlane.xlu0 %1131  ;;  %2020 = vrcp.f32 %v1129_v26  ;;  %v1300_v13 = vsel %vm862_vm3, %v1225_v54, 0  ;;  %v1190_v42 = vmul.f32 %v2011_v63, %v2522_v55 }
 0x3d6   : > { %2022 = vrcp.f32 %v1132_v58  ;;  %1789 = vmatpush3.bf16.xpose.msra.mxu1 %v1300_v13 }
 0x3d7   : > { %v2013_v47 = vpop.eup %2012  ;;  %v1222_v9 = vpack.c.bf16 %v1190_v42, %v1189_v28  ;;  %1790 = vmatprep.subr.bf16.mxu1 %v2112_v3 }
 0x3d8   : > { %v2015_v36 = vpop.eup %2014  ;;  %v1111_v38 = vpop.xlane.xlu1 %1110  ;;  %v1197_v60 = vmul.f32 %v2013_v47, %v2535_v16 }
 0x3d9   : > { %v1114_v18 = vpop.xlane.xlu0 %1113  ;;  %2024 = vrcp.f32 %v1111_v38  ;;  %v1248_v61 = vsel %vm862_vm3, %v1222_v9, 0  ;;  %v1198_v55 = vmul.f32 %v2015_v36, %v2532_v0 }
 0x3da   : > { %2026 = vrcp.f32 %v1114_v18  ;;  %1779 = vmatpush3.bf16.xpose.msra.mxu0 %v1248_v61 }
 0x3db   : > { %v2017_v44 = vpop.eup %2016  ;;  %v1226_v14 = vpack.c.bf16 %v1198_v55, %v1197_v60  ;;  %1796 = vmatprep.subr.bf16.mxu0 %v2112_v3 }
 0x3dc   : > { %v2019_v43 = vpop.eup %2018  ;;  %v1135_v56 = vpop.xlane.xlu1 %1134  ;;  %v1199_v23 = vmul.f32 %v2017_v44, %v2545_v11 }
 0x3dd   : > { %v1138_v16 = vpop.xlane.xlu0 %1137  ;;  %2028 = vrcp.f32 %v1135_v56  ;;  %v1303_v0 = vsel %vm862_vm3, %v1226_v14, 0  ;;  %v1200_v29 = vmul.f32 %v2019_v43, %v2542_v30 }
 0x3de   : > { %2030 = vrcp.f32 %v1138_v16  ;;  %1791 = vmatpush3.bf16.xpose.msra.mxu1 %v1303_v0 }
 0x3df   : > { %v2021_v50 = vpop.eup %2020  ;;  %v1227_v53 = vpack.c.bf16 %v1200_v29, %v1199_v23  ;;  %1808 = vmatprep.subr.bf16.mxu1 %v2112_v3  ;;  %v259_v23 = vld [vmem:[%s2786_s2 + $0x58] sm:$0xff] }
 0x3e0   : > { %v2023_v25 = vpop.eup %2022  ;;  %v1117_v4 = vpop.xlane.xlu1 %1116  ;;  %v1207_v7 = vmul.f32 %v2021_v50, %v2555_v40  ;;  %v357_v29 = vadd.f32 %v2299_v51, %v259_v23  ;;  %v1463_v51 = vld [vmem:[%s2788_s4] sm:$0xff] }
 0x3e1   : > { %v1120_v5 = vpop.xlane.xlu0 %1119  ;;  %2032 = vrcp.f32 %v1117_v4  ;;  %1781 = vmatmul.mubr.msk.bf16.vlgmr.msra.gmra.mrb[20].mxu0 %vm862_vm3, %v1215_v59  ;;  %v1349_v11 = vsel %vm862_vm3, %v1227_v53, 0  ;;  %v1208_v30 = vmul.f32 %v2023_v25, %v2552_v20  ;;  %v2114_v59 = vmov 0   ;;  %v1465_v53 = vld [vmem:[%s2788_s4 + $0x10] sm:$0xff]  ;;  %v1466_v25 = vld [vmem:[%s2788_s4 + $0x18] sm:$0xff] }
 0x3e2   : > { %2034 = vrcp.f32 %v1120_v5  ;;  %1797 = vmatpush3.bf16.xpose.msra.mxu0 %v1349_v11  ;;  %1804 = vmatprep.mubr.msk.bf16.mxu0 %vm2113_vm4, %v2112_v3 }
 0x3e3   : > { %v2025_v52 = vpop.eup %2024  ;;  %v1231_v2 = vpack.c.bf16 %v1208_v30, %v1207_v7  ;;  %1798 = vmatprep.subr.bf16.mxu0 %v2112_v3  ;;  %1918 = vset.pattern.permute.xlu1 %v2114_v59 }
 0x3e4   : > { %v2027_v27 = vpop.eup %2026  ;;  %v1141_v19 = vpop.xlane.xlu1 %1140  ;;  %v1201_v35 = vmul.f32 %v2025_v52, %v2565_v62  ;;  %1919 = vset.pattern.permute.xlu0 %v2114_v59  ;;  %1469 = vperm.xlu1 %1918, %v1463_v51  }
 0x3e5   : > { %v1144_v40 = vpop.xlane.xlu0 %1143  ;;  %2036 = vrcp.f32 %v1141_v19  ;;  %1793 = vmatmul.mubr.msk.bf16.vlgmr.msra.gmra.mrb[24].mxu1 %vm862_vm3, %v1216_v33  ;;  %v1404_v20 = vsel %vm862_vm3, %v1231_v2, 0  ;;  %v1202_v12 = vmul.f32 %v2027_v27, %v2562_v32  ;;  %1474 = vperm.xlu0 %1919, %v1464_v41  }
 0x3e6   : > { %2038 = vrcp.f32 %v1144_v40  ;;  %1809 = vmatpush3.bf16.xpose.msra.mxu1 %v1404_v20  ;;  %1816 = vmatprep.mubr.msk.bf16.mxu1 %vm2113_vm4, %v2112_v3 }
 0x3e7   : > { %v2029_v48 = vpop.eup %2028  ;;  %v1228_v10 = vpack.c.bf16 %v1202_v12, %v1201_v35  ;;  %1810 = vmatprep.subr.bf16.mxu1 %v2112_v3 }
 0x3e8   : > { %v2031_v21 = vpop.eup %2030  ;;  %v1123_v17 = vpop.xlane.xlu1 %1122  ;;  %v1209_v62 = vmul.f32 %v2029_v48, %v2575_v6  ;;  %1479 = vperm.xlu1 %1918, %v1465_v53   ;;  %v1457_v48 = vld [vmem:[%s2787_s3 + $0x10] sm:$0xff] }
 0x3e9   : > { %v1126_v54 = vpop.xlane.xlu0 %1125  ;;  %2040 = vrcp.f32 %v1123_v17  ;;  %v1352_v63 = vsel %vm862_vm3, %v1228_v10, 0  ;;  %v1210_v26 = vmul.f32 %v2031_v21, %v2572_v8  ;;  %v1458_v10 = vld [vmem:[%s2787_s3 + $0x18] sm:$0xff] }
 0x3ea   : > { %2042 = vrcp.f32 %v1126_v54  ;;  %1799 = vmatpush3.bf16.xpose.msra.mxu0 %v1352_v63  ;;  %v1460_v63 = vpack.c.bf16 %v1458_v10, %v1457_v48 }
 0x3eb   : > { %v2033_v32 = vpop.eup %2032  ;;  %v1232_v58 = vpack.c.bf16 %v1210_v26, %v1209_v62  ;;  %1800 = vmatprep.subr.bf16.mxu0 %v2112_v3 }
 0x3ec   : > { %v2035_v28 = vpop.eup %2034  ;;  %v1147_v13 = vpop.xlane.xlu1 %1146  ;;  %v1203_v47 = vmul.f32 %v2033_v32, %v2584_v31  ;;  %1484 = vperm.xlu1 %1918, %v1466_v25  }
 0x3ed   : > { %v1150_v42 = vpop.xlane.xlu0 %1149  ;;  %2044 = vrcp.f32 %v1147_v13  ;;  %v1407_v9 = vsel %vm862_vm3, %v1232_v58, 0  ;;  %v1204_v6 = vmul.f32 %v2035_v28, %v2581_v39 }
 0x3ee   : > { %2046 = vrcp.f32 %v1150_v42  ;;  %1811 = vmatpush3.bf16.xpose.msra.mxu1 %v1407_v9 }
 0x3ef   : > { %v2037_v36 = vpop.eup %2036  ;;  %v1229_v8 = vpack.c.bf16 %v1204_v6, %v1203_v47  ;;  %1812 = vmatprep.subr.bf16.mxu1 %v2112_v3 }
 0x3f0   : > { %v2039_v34 = vpop.eup %2038  ;;  %v1211_v38 = vmul.f32 %v2037_v36, %v2592_v15 }
 0x3f1   : > { %v1355_v18 = vsel %vm862_vm3, %v1229_v8, 0  ;;  %v1212_v60 = vmul.f32 %v2039_v34, %v2590_v1  ;;  %v258_v1 = vld [vmem:[%s2786_s2 + $0x50] sm:$0xff] }
 0x3f2   : > { %1801 = vmatpush3.bf16.xpose.msra.mxu0 %v1355_v18  ;;  %v354_v16 = vadd.f32 %v2295_v49, %v258_v1  ;;  %v1455_v49 = vld [vmem:[%s2787_s3] sm:$0xff] }
 0x3f3   : > { %v2041_v31 = vpop.eup %2040  ;;  %v1233_v61 = vpack.c.bf16 %v1212_v60, %v1211_v38  ;;  %1802 = vmatprep.subr.bf16.mxu0 %v2112_v3 }
 0x3f4   : > { %v2043_v55 = vpop.eup %2042  ;;  %v1205_v39 = vmul.f32 %v2041_v31, %v2600_v45  ;;  %v1217_v0 = vpack.c.bf16 %v354_v16, %v354_v16 }
 0x3f5   : > { %v1410_v44 = vsel %vm862_vm3, %v1233_v61, 0  ;;  %v1206_v46 = vmul.f32 %v2043_v55, %v2598_v37 }
 0x3f6   : > { %1813 = vmatpush3.bf16.xpose.msra.mxu1 %v1410_v44 }
 0x3f7   : > { %v2045_v14 = vpop.eup %2044  ;;  %v1230_v43 = vpack.c.bf16 %v1206_v46, %v1205_v39  ;;  %1814 = vmatprep.subr.bf16.mxu1 %v2112_v3 }
 0x3f8   : > { %v2047_v15 = vpop.eup %2046  ;;  %v1213_v57 = vmul.f32 %v2045_v14, %v2608_v24  ;;  %v1218_v24 = vpack.c.bf16 %v357_v29, %v357_v29 }
 0x3f9   : > { %v1358_v56 = vsel %vm862_vm3, %v1230_v43, 0  ;;  %v1214_v45 = vmul.f32 %v2047_v15, %v2606_v22  ;;  %v1456_v22 = vld [vmem:[%s2787_s3 + $0x8] sm:$0xff] }
 0x3fa   : > { %1803 = vmatpush3.bf16.xpose.msra.mxu0 %v1358_v56  ;;  %v1459_v50 = vpack.c.bf16 %v1456_v22, %v1455_v49 }
 0x3fb   : > { %v1234_v37 = vpack.c.bf16 %v1214_v45, %v1213_v57 }
 0x3fd   : > { %v1413_v3 = vsel %vm862_vm3, %v1234_v37, 0 }
 0x3fe   : > { %1815 = vmatpush3.bf16.xpose.msra.mxu1 %v1413_v3 }
 0x401   : > { %1805 = vmatmul.mubr.msk.bf16.vlgmr.msra.gmra.mrb[24].mxu0 %vm862_vm3, %v1217_v0 }
 0x402   : > { %1824 = vmatprep.mubr.msk.bf16.mxu0 %vm260_vm0, %v1459_v50 }
 0x405   : > { %1817 = vmatmul.mubr.msk.bf16.vlgmr.msra.gmra.mrb[28].mxu1 %vm862_vm3, %v1218_v24 }
 0x463   : > { %v1470_v26 = vpop.permute.xlu1 %1469 }
 0x464   : > { %v1475_v42 = vpop.permute.xlu0 %1474 }
 0x467   : > { %v1480_v32 = vpop.permute.xlu1 %1479 }
 0x46b   : > { %v1485_v47 = vpop.permute.xlu1 %1484 }
 0x4b4   : > { %v1284_v4 = vpop.f32.mrb[20].mxu0 }
 0x4b5   : > { %v1782_v5 = vpop.f32.mrb[21].mxu0 }
 0x4b6   : > { %v1287_v7 = vpop.f32.mrb[22].mxu0 }
 0x4b7   : > { %v1783_v11 = vpop.f32.mrb[23].mxu0 }
 0x4b8   : > { %v1339_v30 = vpop.f32.mrb[24].mxu1 }
 0x4b9   : > { %v1461_v52 = vpack.c.bf16 %v1339_v30, %v1284_v4  ;;  %v1794_v33 = vpop.f32.mrb[25].mxu1 }
 0x4ba   : > { %v1342_v2 = vpop.f32.mrb[26].mxu1 }
 0x4bb   : > { %v1795_v27 = vpop.f32.mrb[27].mxu1  ;;  %1820 = vmatprep.subr.bf16.mxu0 %v1461_v52 }
 0x4bc   : > { %1821 = vmatpush3.bf16.msra.mxu0 %v1461_v52 }
 0x4d4   : > { %v1394_v19 = vpop.f32.mrb[24].mxu0 }
 0x4d5   : > { %v1806_v40 = vpop.f32.mrb[25].mxu0 }
 0x4d6   : > { %v1397_v35 = vpop.f32.mrb[26].mxu0 }
 0x4d7   : > { %v1807_v20 = vpop.f32.mrb[27].mxu0 }
 0x4d8   : > { %v1449_v12 = vpop.f32.mrb[28].mxu1 }
 0x4d9   : > { %v1462_v21 = vpack.c.bf16 %v1449_v12, %v1394_v19  ;;  %v1818_v17 = vpop.f32.mrb[29].mxu1 }
 0x4da   : > { %v1452_v54 = vpop.f32.mrb[30].mxu1 }
 0x4db   : > { %v1819_v62 = vpop.f32.mrb[31].mxu1  ;;  %1822 = vmatprep.subr.bf16.mxu0 %v1462_v21 }
 0x4dc   : > { %1823 = vmatpush3.bf16.msra.mxu0 %v1462_v21 }
 0x4df   : > { %1825 = vmatmul.mubr.msk.bf16.vlgmr.msra.gmra.mrb[28].mxu0 %vm260_vm0, %v1460_v63 }
 0x5b2   : > { %v1826_v58 = vpop.f32.mrb[28].mxu0 }
 0x5b3   : > { %v1536_v28 = vadd.f32 %v1826_v58, %v1480_v32  ;;  %v1527_v13 = vpop.f32.mrb[29].mxu0 }
 0x5b4   : > { %v1528_v9 = vadd.f32 %v1527_v13, %v1470_v26  ;;  %v1827_v6 = vpop.f32.mrb[30].mxu0 }
 0x5b5   : > { %1544 = vst.msk [vmem:[%s217_s12 + $0x10] sm:$0xff] %vm862_vm3, %v1536_v28  ;;  %v1539_v36 = vadd.f32 %v1827_v6, %v1485_v47  ;;  %v1530_v8 = vpop.f32.mrb[31].mxu0 }
 0x5b6   : > { %1542 = vst.msk [vmem:[%s217_s12] sm:$0xff] %vm862_vm3, %v1528_v9  ;;  %v1531_v34 = vadd.f32 %v1530_v8, %v1475_v42 }
 0x5b7   : > { %1545 = vst.msk [vmem:[%s217_s12 + $0x18] sm:$0xff] %vm862_vm3, %v1539_v36 }
 0x5b8   : > { %1543 = vst.msk [vmem:[%s217_s12 + $0x8] sm:$0xff] %vm862_vm3, %v1531_v34 }
 0x5b9   : > { %2061 = shalt.err (!%p2058_p3)
}
 0x5ba   : > { %s2062_s6 = scalar_lea.hbm %s2738_s22, 512  ;;  %s2066_s9 = scalar_lea.hbm %s2789_s5, 1024 }
 0x5bb   : > { %p2063_p4 = scmp.ne.s32.totalorder %s2738_s22, %s2062_s6  ;;  %p2067_p9 = scmp.lt.u32.totalorder %s2738_s22, %s2789_s5 }
 0x5bc   : > { %p2068_p10 = scmp.lt.u32.totalorder %s2066_s9, %s2062_s6  ;;  %p2070_p12 = scmp.lt.u32.totalorder %s2062_s6, %s2738_s22 }
 0x5bd   : > { %p2064_p7 = pnand %p2063_p4, %p2186_p5 }
 0x5be   : > { %p2069_p11 = por %p2068_p10, %p2067_p9 }
 0x5bf   : > { %p2065_p8 = pneg %p2064_p7 }
 0x5c0   : > { %p2071_p13 = por %p2070_p12, %p2069_p11 }
 0x5c2   : > { %p2072_p0 = pnand %p2071_p13, %p2065_p8 }
 0x5c4   : > { %2075 = shalt.err (!%p2072_p0)
}
 0x5c5   : > { %s2116_s12 = smov 128   ;;  %s2117_s14 = smov 8  }
 0x5c6   : > { %1832 = dma.vmem_to_hbm [thread:$0]  (%p2186_p5), %s2733_s13, 512, %s2738_s22, %s2743_s17, %s2116_s12, %s2116_s12, %s2117_s14  }
 0x5c7 PF: > { %p1838_p1 = scmp.ge.s32.totalorder %s2110_s21, 2  ;;  %s1575_s15 = sand.u32 1, %s2098_s18  }
 0x5c8   : > { %s1576_s16 = scalar_lea.sflag [#allocation3], %s1575_s15 }
 0x5c9   : > { %p1835_p2 = pnand %p1838_p1, %p2190_p6 }
 0x5cb   : > { %2093 = dma.done.wait (!%p1835_p2), %s1576_s16, 512  }
 0x5cc   : > { %2095 = vsyncadd (!%p1835_p2), %s1576_s16, 4294966784  ;;  %p15_p3 = scmp.ge.s32.totalorder %s2173_s24, 4   ;;  %s2792_s18 = smov %s2102_s19 }
 0x5cd   : > { %s2793_s19 = smov %s2106_s20  ;;  %s2794_s20 = smov %s2184_s27 }
 0x5ce   : > { %s2795_s21 = smov %s2173_s24  ;;  %17 = sbr.rel (!%p15_p3) target bundleno = 3 (0x3), region = 75 }
 0x5d5   :  { %1581 = vsyncpa [#allocation3], 1 }
 0x5d6   :  { %1583 = vsyncpa [#allocation3 + $0x1], 1 }

</bundles_post_ra>
